<compile_context>
chip_gen: v7x
topology: tpu7x:2x2x1
jax: 0.10.0
libtpu: 0.0.40
codegen_flags: <defaults>
</compile_context>

<pallas_src>
import functools
import math

import jax
import jax.numpy as jnp
from jax import lax
from jax.experimental import pallas as pl
from jax.experimental.pallas import tpu as pltpu


def _leaky_relu(x, slope=0.01):
    return jnp.where(x > 0, x, slope * x)


# dot_general dimension numbers: contract the LAST dim of both operands
# (i.e. A @ B.T) — natively supported on the MXU, no explicit transpose.
_TRANS_B = (((1,), (1,)), ((), ()))


def branch_three_kernel(
    x_ref,        # (bb, D, HxW)   x (channels-last flatten), transposed
    enc_ref,      # (C, HxW)       encoder_M
    a1_ref,       # (C, C)         GCNLayer1 A
    w1_ref,       # (D, hidden)    GCNLayer1 weights
    ewt_ref,      # (C, C)         Linear E weight, pre-transposed (in, out)
    eb_ref,       # (1, C)
    fwt_ref,      # (C, C)
    fb_ref,       # (1, C)
    gwt_ref,      # (C, C)
    gb_ref,       # (1, C)
    beita_ref,    # (C, C)
    w2t_ref,      # (out_f, hidden) GCNLayer2 weights, pre-transposed
    dect_ref,     # (C, HxW)        decoder_M, pre-transposed
    out_ref,      # (bb, out_f, HxW)  transposed (lane-dense) output
    *,
    bb,
):
    enc = enc_ref[...]
    a1 = a1_ref[...]
    w1 = w1_ref[...]
    ewt = ewt_ref[...]
    eb = eb_ref[...]
    fwt = fwt_ref[...]
    fb = fb_ref[...]
    gwt = gwt_ref[...]
    gb = gb_ref[...]
    beita = beita_ref[...]
    w2t = w2t_ref[...]
    dect = dect_ref[...]

    for b in range(bb):
        x_t = x_ref[b]                                                  # (D, HxW)

        # encoder:  v = encoder_M @ x_flat  (contract HxW, both lane-dense)
        v = lax.dot_general(enc, x_t, _TRANS_B,
                            preferred_element_type=jnp.float32)         # (C, D)

        # --- GCNLayer1 ---
        t = jnp.dot(a1, v, preferred_element_type=jnp.float32)          # (C, D)
        v1 = _leaky_relu(
            jnp.dot(t, w1, preferred_element_type=jnp.float32))         # (C, hidden)
        # TODO(synk): F.dropout on v1 skipped (eval mode identity).

        # --- GCNLayer2 ---
        # nn.Linear with host-pre-transposed weights: y = v @ W.T + b
        E = jnp.dot(v, ewt, preferred_element_type=jnp.float32) + eb    # (C, C)
        Fm = jnp.dot(v, fwt, preferred_element_type=jnp.float32) + fb   # (C, C)
        G = jnp.dot(v, gwt, preferred_element_type=jnp.float32) + gb    # (C, C)

        EF = jnp.dot(E, Fm, preferred_element_type=jnp.float32)         # (C, C)
        m = jnp.max(EF, axis=-1, keepdims=True)
        p = jnp.exp(EF - m)
        a = p / jnp.sum(p, axis=-1, keepdims=True)                      # softmax(-1)

        aG = jnp.dot(a, G, preferred_element_type=jnp.float32)          # (C, C)
        amat = beita * aG + v                                           # (C, C)

        t2 = jnp.dot(amat, v1, preferred_element_type=jnp.float32)      # (C, hidden)
        # v2^T computed directly: leaky((t2 @ W2)^T) = leaky(W2^T ·_h t2)
        v2_t = _leaky_relu(
            lax.dot_general(w2t, t2, _TRANS_B,
                            preferred_element_type=jnp.float32))        # (out_f, C)

        # decoder (transposed, lane-dense store): out^T = v2^T @ dec^T
        out_ref[b] = jnp.dot(v2_t, dect,
                             preferred_element_type=jnp.float32)        # (out_f, HxW)


def branch_three_forward(x, params, *, batch_block=1):
    """x: (B, H, W, C) float32.  Returns (B, H*W, output_features)."""
    B, H, W, C = x.shape
    HxW = H * W
    D = C
    hidden = params["W1"].shape[1]
    out_f = params["W2"].shape[1]
    bb = batch_block
    assert B % bb == 0, (B, bb)

    # channels-last flatten (as the PyTorch module), HxW moved to lane axis.
    x_t = x.reshape(B, HxW, D).transpose(0, 2, 1)          # (B, D, HxW)

    # host-side layout prep: pre-transposed weights, lane-dense decoder.
    ewt = params["E_w"].T
    fwt = params["F_w"].T
    gwt = params["G_w"].T
    w2t = params["W2"].T                                   # (out_f, hidden)
    dect = params["decoder_M"].T                           # (C, HxW)

    def full(shape):
        nd = len(shape)
        return pl.BlockSpec(shape, lambda i, _nd=nd: (0,) * _nd)

    in_specs = [
        pl.BlockSpec((bb, D, HxW), lambda i: (i, 0, 0)),   # x (transposed)
        full((C, HxW)),                                    # encoder_M
        full((C, C)),                                      # A1
        full((D, hidden)),                                 # W1
        full((C, C)), full((1, C)),                        # E weight^T / bias
        full((C, C)), full((1, C)),                        # F weight^T / bias
        full((C, C)), full((1, C)),                        # G weight^T / bias
        full((C, C)),                                      # beita
        full((out_f, hidden)),                             # W2^T
        full((C, HxW)),                                    # decoder_M^T
    ]
    out_spec = pl.BlockSpec((bb, out_f, HxW), lambda i: (i, 0, 0))

    fn = pl.pallas_call(
        functools.partial(branch_three_kernel, bb=bb),
        out_shape=jax.ShapeDtypeStruct((B, out_f, HxW), jnp.float32),
        grid_spec=pltpu.PrefetchScalarGridSpec(
            num_scalar_prefetch=0,
            grid=(B // bb,),
            in_specs=in_specs,
            out_specs=out_spec,
        ),
        compiler_params=pltpu.CompilerParams(
            dimension_semantics=("parallel",)
        ),
    )
    out_t = fn(
        x_t,
        params["encoder_M"],
        params["A1"],
        params["W1"],
        ewt, params["E_b"],
        fwt, params["F_b"],
        gwt, params["G_b"],
        params["beita"],
        w2t,
        dect,
    )
    return out_t.transpose(0, 2, 1)                        # (B, HxW, out_f)


def branch_three_reference(x, params):
    """Pure-JAX reference reproducing the PyTorch forward (eval mode)."""
    B, H, W, C = x.shape
    HxW = H * W
    ein = functools.partial(jnp.einsum, precision=jax.lax.Precision.HIGHEST)

    x_flat = x.reshape(B, HxW, C)
    v = ein("ck,bkd->bcd", params["encoder_M"], x_flat)                 # (B,C,D)
    # GCN1
    t = ein("ce,bed->bcd", params["A1"], v)
    v1 = jax.nn.leaky_relu(ein("bcd,dh->bch", t, params["W1"]), 0.01)
    # GCN2
    E = ein("bcd,ed->bce", v, params["E_w"]) + params["E_b"]
    Fm = ein("bcd,ed->bce", v, params["F_w"]) + params["F_b"]
    G = ein("bcd,ed->bce", v, params["G_w"]) + params["G_b"]
    a = jax.nn.softmax(ein("bce,bef->bcf", E, Fm), axis=2)
    aG = ein("bcf,bfe->bce", a, G)
    Amat = params["beita"][None] * aG + v
    t2 = ein("bce,beh->bch", Amat, v1)
    v2 = jax.nn.leaky_relu(ein("bch,ho->bco", t2, params["W2"]), 0.01)
    return ein("kc,bco->bko", params["decoder_M"], v2)


def init_params(key, C, HxW, hidden, out_f):
    """Deterministic uniform init mimicking the PyTorch reset_parameters."""
    D = C
    ks = jax.random.split(key, 12)

    def u(k, shape, std):
        return jax.random.uniform(k, shape, jnp.float32, -std, std)

    p = {}
    p["encoder_M"] = u(ks[0], (C, HxW), 1.0 / math.sqrt(HxW))
    p["decoder_M"] = u(ks[1], (HxW, C), 1.0 / math.sqrt(C))
    # GCNLayer1
    p["A1"] = u(ks[2], (C, C), 1.0 / math.sqrt(C))
    p["W1"] = u(ks[3], (D, hidden), 1.0 / math.sqrt(hidden))
    # GCNLayer2 linears (nn.Linear(C, C)-style init U(-1/sqrt(C), 1/sqrt(C)))
    lin_std = 1.0 / math.sqrt(C)
    p["E_w"] = u(ks[4], (C, C), lin_std)
    p["E_b"] = u(ks[5], (1, C), lin_std)
    p["F_w"] = u(ks[6], (C, C), lin_std)
    p["F_b"] = u(ks[7], (1, C), lin_std)
    p["G_w"] = u(ks[8], (C, C), lin_std)
    p["G_b"] = u(ks[9], (1, C), lin_std)
    p["beita"] = u(ks[10], (C, C), 1.0 / math.sqrt(C))
    p["W2"] = u(ks[11], (hidden, out_f), 1.0 / math.sqrt(out_f))
    return p


if __name__ == "__main__":
    B, H, W, C = 2, 16, 16, 4      # in_channel = 4, height = width = 16
    hidden_num, output_features = 32, 16
    HxW = H * W

    key = jax.random.PRNGKey(0)
    kx, kp = jax.random.split(key)
    x = jax.random.normal(kx, (B, H, W, C), jnp.float32)
    params = init_params(kp, C, HxW, hidden_num, output_features)

    ref = jax.block_until_ready(branch_three_reference(x, params))

    # batch_block=1: one element per grid step (keeps both v7x TensorCores busy).
    # batch_block=2: pack the batch into one step (amortizes per-step overhead
    #                on single-TC v5e/v6e).
    for bb in (1, 2):
        out = jax.block_until_ready(branch_three_forward(x, params, batch_block=bb))
        assert out.shape == (B, HxW, output_features), out.shape
        if not jnp.allclose(out, ref, atol=1e-3, rtol=1e-3):
            raise AssertionError(
                f"Pallas kernel output mismatch vs JAX reference (batch_block={bb})")

    print("KERNEL_OK")
</pallas_src>

<mosaic_0001>
module attributes {stable_mosaic.version = 11 : i64} {
  func.func @branch_three_kernel(%arg0: i32, %arg1: memref<1x4x256xf32, #tpu.memory_space<vmem>>, %arg2: memref<4x256xf32, #tpu.memory_space<vmem>>, %arg3: memref<4x4xf32, #tpu.memory_space<vmem>>, %arg4: memref<4x32xf32, #tpu.memory_space<vmem>>, %arg5: memref<4x4xf32, #tpu.memory_space<vmem>>, %arg6: memref<1x4xf32, #tpu.memory_space<vmem>>, %arg7: memref<4x4xf32, #tpu.memory_space<vmem>>, %arg8: memref<1x4xf32, #tpu.memory_space<vmem>>, %arg9: memref<4x4xf32, #tpu.memory_space<vmem>>, %arg10: memref<1x4xf32, #tpu.memory_space<vmem>>, %arg11: memref<4x4xf32, #tpu.memory_space<vmem>>, %arg12: memref<16x32xf32, #tpu.memory_space<vmem>>, %arg13: memref<4x256xf32, #tpu.memory_space<vmem>>, %arg14: memref<1x16x256xf32, #tpu.memory_space<vmem>>) attributes {dimension_semantics = [#tpu.dimension_semantics<parallel>], iteration_bounds = array<i64: 2>, scalar_prefetch = 0 : i64, scratch_operands = 0 : i64, tpu.core_type = #tpu.core_type<tc>, window_params = [{transform_indices = @transform_0, window_bounds = array<i64: 1, 4, 256>}, {pipeline_mode = #tpu.pipeline_mode<synchronous>, transform_indices = @transform_1, window_bounds = array<i64: 4, 256>}, {pipeline_mode = #tpu.pipeline_mode<synchronous>, transform_indices = @transform_2, window_bounds = array<i64: 4, 4>}, {pipeline_mode = #tpu.pipeline_mode<synchronous>, transform_indices = @transform_3, window_bounds = array<i64: 4, 32>}, {pipeline_mode = #tpu.pipeline_mode<synchronous>, transform_indices = @transform_4, window_bounds = array<i64: 4, 4>}, {pipeline_mode = #tpu.pipeline_mode<synchronous>, transform_indices = @transform_5, window_bounds = array<i64: 1, 4>}, {pipeline_mode = #tpu.pipeline_mode<synchronous>, transform_indices = @transform_6, window_bounds = array<i64: 4, 4>}, {pipeline_mode = #tpu.pipeline_mode<synchronous>, transform_indices = @transform_7, window_bounds = array<i64: 1, 4>}, {pipeline_mode = #tpu.pipeline_mode<synchronous>, transform_indices = @transform_8, window_bounds = array<i64: 4, 4>}, {pipeline_mode = #tpu.pipeline_mode<synchronous>, transform_indices = @transform_9, window_bounds = array<i64: 1, 4>}, {pipeline_mode = #tpu.pipeline_mode<synchronous>, transform_indices = @transform_10, window_bounds = array<i64: 4, 4>}, {pipeline_mode = #tpu.pipeline_mode<synchronous>, transform_indices = @transform_11, window_bounds = array<i64: 16, 32>}, {pipeline_mode = #tpu.pipeline_mode<synchronous>, transform_indices = @transform_12, window_bounds = array<i64: 4, 256>}, {transform_indices = @transform_13, window_bounds = array<i64: 1, 16, 256>}]} {
    %c0 = arith.constant 0 : index
    %c0_0 = arith.constant 0 : index
    %0 = vector.load %arg2[%c0, %c0_0] : memref<4x256xf32, #tpu.memory_space<vmem>>, vector<4x256xf32>
    %c0_1 = arith.constant 0 : index
    %c0_2 = arith.constant 0 : index
    %1 = vector.load %arg3[%c0_1, %c0_2] : memref<4x4xf32, #tpu.memory_space<vmem>>, vector<4x4xf32>
    %c0_3 = arith.constant 0 : index
    %c0_4 = arith.constant 0 : index
    %2 = vector.load %arg4[%c0_3, %c0_4] : memref<4x32xf32, #tpu.memory_space<vmem>>, vector<4x32xf32>
    %c0_5 = arith.constant 0 : index
    %c0_6 = arith.constant 0 : index
    %3 = vector.load %arg5[%c0_5, %c0_6] : memref<4x4xf32, #tpu.memory_space<vmem>>, vector<4x4xf32>
    %c0_7 = arith.constant 0 : index
    %c0_8 = arith.constant 0 : index
    %4 = vector.load %arg6[%c0_7, %c0_8] : memref<1x4xf32, #tpu.memory_space<vmem>>, vector<1x4xf32>
    %c0_9 = arith.constant 0 : index
    %c0_10 = arith.constant 0 : index
    %5 = vector.load %arg7[%c0_9, %c0_10] : memref<4x4xf32, #tpu.memory_space<vmem>>, vector<4x4xf32>
    %c0_11 = arith.constant 0 : index
    %c0_12 = arith.constant 0 : index
    %6 = vector.load %arg8[%c0_11, %c0_12] : memref<1x4xf32, #tpu.memory_space<vmem>>, vector<1x4xf32>
    %c0_13 = arith.constant 0 : index
    %c0_14 = arith.constant 0 : index
    %7 = vector.load %arg9[%c0_13, %c0_14] : memref<4x4xf32, #tpu.memory_space<vmem>>, vector<4x4xf32>
    %c0_15 = arith.constant 0 : index
    %c0_16 = arith.constant 0 : index
    %8 = vector.load %arg10[%c0_15, %c0_16] : memref<1x4xf32, #tpu.memory_space<vmem>>, vector<1x4xf32>
    %c0_17 = arith.constant 0 : index
    %c0_18 = arith.constant 0 : index
    %9 = vector.load %arg11[%c0_17, %c0_18] : memref<4x4xf32, #tpu.memory_space<vmem>>, vector<4x4xf32>
    %c0_19 = arith.constant 0 : index
    %c0_20 = arith.constant 0 : index
    %10 = vector.load %arg12[%c0_19, %c0_20] : memref<16x32xf32, #tpu.memory_space<vmem>>, vector<16x32xf32>
    %c0_21 = arith.constant 0 : index
    %c0_22 = arith.constant 0 : index
    %11 = vector.load %arg13[%c0_21, %c0_22] : memref<4x256xf32, #tpu.memory_space<vmem>>, vector<4x256xf32>
    %c0_23 = arith.constant 0 : index
    %c0_24 = arith.constant 0 : index
    %c0_25 = arith.constant 0 : index
    %12 = vector.load %arg1[%c0_23, %c0_24, %c0_25] : memref<1x4x256xf32, #tpu.memory_space<vmem>>, vector<1x4x256xf32>
    %13 = vector.shape_cast %12 : vector<1x4x256xf32> to vector<4x256xf32>
    %cst = arith.constant dense<0.000000e+00> : vector<4x4xf32>
    %14 = tpu.matmul %0, %13, %cst {dimension_numbers = #tpu.dot_dimension_numbers<[1], [1], [0], [0], [0, 0, 1, 0], [], []>} : vector<4x256xf32>, vector<4x256xf32>, vector<4x4xf32> -> vector<4x4xf32>
    %cst_26 = arith.constant dense<0.000000e+00> : vector<4x4xf32>
    %15 = tpu.matmul %1, %14, %cst_26 {dimension_numbers = #tpu.dot_dimension_numbers<[1], [0], [0], [1], [0, 0, 1, 1], [], []>} : vector<4x4xf32>, vector<4x4xf32>, vector<4x4xf32> -> vector<4x4xf32>
    %cst_27 = arith.constant dense<0.000000e+00> : vector<4x32xf32>
    %16 = tpu.matmul %15, %2, %cst_27 {dimension_numbers = #tpu.dot_dimension_numbers<[1], [0], [0], [1], [0, 0, 1, 1], [], []>} : vector<4x4xf32>, vector<4x32xf32>, vector<4x32xf32> -> vector<4x32xf32>
    %cst_28 = arith.constant 0.000000e+00 : f32
    %17 = vector.broadcast %cst_28 : f32 to vector<4x32xf32>
    %18 = arith.cmpf ogt, %16, %17 : vector<4x32xf32>
    %cst_29 = arith.constant 0.00999999977 : f32
    %19 = vector.broadcast %cst_29 : f32 to vector<4x32xf32>
    %20 = arith.mulf %19, %16 : vector<4x32xf32>
    %21 = arith.select %18, %16, %20 : vector<4x32xi1>, vector<4x32xf32>
    %cst_30 = arith.constant dense<0.000000e+00> : vector<4x4xf32>
    %22 = tpu.matmul %14, %3, %cst_30 {dimension_numbers = #tpu.dot_dimension_numbers<[1], [0], [0], [1], [0, 0, 1, 1], [], []>} : vector<4x4xf32>, vector<4x4xf32>, vector<4x4xf32> -> vector<4x4xf32>
    %23 = vector.broadcast %4 : vector<1x4xf32> to vector<4x4xf32>
    %24 = arith.addf %22, %23 : vector<4x4xf32>
    %cst_31 = arith.constant dense<0.000000e+00> : vector<4x4xf32>
    %25 = tpu.matmul %14, %5, %cst_31 {dimension_numbers = #tpu.dot_dimension_numbers<[1], [0], [0], [1], [0, 0, 1, 1], [], []>} : vector<4x4xf32>, vector<4x4xf32>, vector<4x4xf32> -> vector<4x4xf32>
    %26 = vector.broadcast %6 : vector<1x4xf32> to vector<4x4xf32>
    %27 = arith.addf %25, %26 : vector<4x4xf32>
    %cst_32 = arith.constant dense<0.000000e+00> : vector<4x4xf32>
    %28 = tpu.matmul %14, %7, %cst_32 {dimension_numbers = #tpu.dot_dimension_numbers<[1], [0], [0], [1], [0, 0, 1, 1], [], []>} : vector<4x4xf32>, vector<4x4xf32>, vector<4x4xf32> -> vector<4x4xf32>
    %29 = vector.broadcast %8 : vector<1x4xf32> to vector<4x4xf32>
    %30 = arith.addf %28, %29 : vector<4x4xf32>
    %cst_33 = arith.constant dense<0.000000e+00> : vector<4x4xf32>
    %31 = tpu.matmul %24, %27, %cst_33 {dimension_numbers = #tpu.dot_dimension_numbers<[1], [0], [0], [1], [0, 0, 1, 1], [], []>} : vector<4x4xf32>, vector<4x4xf32>, vector<4x4xf32> -> vector<4x4xf32>
    %cst_34 = arith.constant dense<0xFF800000> : vector<4xf32>
    %32 = vector.multi_reduction <maximumf>, %31, %cst_34 [1] : vector<4x4xf32> to vector<4xf32>
    %33 = vector.shape_cast %32 : vector<4xf32> to vector<4x1xf32>
    %34 = vector.broadcast %33 : vector<4x1xf32> to vector<4x4xf32>
    %35 = arith.subf %31, %34 : vector<4x4xf32>
    %36 = math.exp %35 : vector<4x4xf32>
    %cst_35 = arith.constant dense<0.000000e+00> : vector<4xf32>
    %37 = vector.multi_reduction <add>, %36, %cst_35 [1] : vector<4x4xf32> to vector<4xf32>
    %38 = vector.shape_cast %37 : vector<4xf32> to vector<4x1xf32>
    %39 = vector.broadcast %38 : vector<4x1xf32> to vector<4x4xf32>
    %40 = arith.divf %36, %39 : vector<4x4xf32>
    %cst_36 = arith.constant dense<0.000000e+00> : vector<4x4xf32>
    %41 = tpu.matmul %40, %30, %cst_36 {dimension_numbers = #tpu.dot_dimension_numbers<[1], [0], [0], [1], [0, 0, 1, 1], [], []>} : vector<4x4xf32>, vector<4x4xf32>, vector<4x4xf32> -> vector<4x4xf32>
    %42 = arith.mulf %9, %41 : vector<4x4xf32>
    %43 = arith.addf %42, %14 : vector<4x4xf32>
    %cst_37 = arith.constant dense<0.000000e+00> : vector<4x32xf32>
    %44 = tpu.matmul %43, %21, %cst_37 {dimension_numbers = #tpu.dot_dimension_numbers<[1], [0], [0], [1], [0, 0, 1, 1], [], []>} : vector<4x4xf32>, vector<4x32xf32>, vector<4x32xf32> -> vector<4x32xf32>
    %cst_38 = arith.constant dense<0.000000e+00> : vector<16x4xf32>
    %45 = tpu.matmul %10, %44, %cst_38 {dimension_numbers = #tpu.dot_dimension_numbers<[1], [1], [0], [0], [0, 0, 1, 0], [], []>} : vector<16x32xf32>, vector<4x32xf32>, vector<16x4xf32> -> vector<16x4xf32>
    %cst_39 = arith.constant 0.000000e+00 : f32
    %46 = vector.broadcast %cst_39 : f32 to vector<16x4xf32>
    %47 = arith.cmpf ogt, %45, %46 : vector<16x4xf32>
    %cst_40 = arith.constant 0.00999999977 : f32
    %48 = vector.broadcast %cst_40 : f32 to vector<16x4xf32>
    %49 = arith.mulf %48, %45 : vector<16x4xf32>
    %50 = arith.select %47, %45, %49 : vector<16x4xi1>, vector<16x4xf32>
    %cst_41 = arith.constant dense<0.000000e+00> : vector<16x256xf32>
    %51 = tpu.matmul %50, %11, %cst_41 {dimension_numbers = #tpu.dot_dimension_numbers<[1], [0], [0], [1], [0, 0, 1, 1], [], []>} : vector<16x4xf32>, vector<4x256xf32>, vector<16x256xf32> -> vector<16x256xf32>
    %c0_42 = arith.constant 0 : index
    %c0_43 = arith.constant 0 : index
    %c0_44 = arith.constant 0 : index
    %52 = vector.load %arg14[%c0_42, %c0_43, %c0_44] : memref<1x16x256xf32, #tpu.memory_space<vmem>>, vector<1x16x256xf32>
    %53 = vector.shape_cast %52 : vector<1x16x256xf32> to vector<16x256xf32>
    %54 = vector.shape_cast %51 : vector<16x256xf32> to vector<1x16x256xf32>
    tpu.vector_store %arg14[%c0_42, %c0_43, %c0_44], %54 {strides = array<i32>} : memref<1x16x256xf32, #tpu.memory_space<vmem>>, vector<1x16x256xf32>,
    return
  }
  func.func @transform_0(%arg0: i32) -> (i32, i32, i32) {
    %c0_i32 = arith.constant 0 : i32
    %c0_i32_0 = arith.constant 0 : i32
    %c0_i32_1 = arith.constant 0 : i32
    return %arg0, %c0_i32, %c0_i32_0 : i32, i32, i32
  }
  func.func @transform_1(%arg0: i32) -> (i32, i32) {
    %c0_i32 = arith.constant 0 : i32
    %c0_i32_0 = arith.constant 0 : i32
    %c0_i32_1 = arith.constant 0 : i32
    return %c0_i32, %c0_i32_0 : i32, i32
  }
  func.func @transform_2(%arg0: i32) -> (i32, i32) {
    %c0_i32 = arith.constant 0 : i32
    %c0_i32_0 = arith.constant 0 : i32
    %c0_i32_1 = arith.constant 0 : i32
    return %c0_i32, %c0_i32_0 : i32, i32
  }
  func.func @transform_3(%arg0: i32) -> (i32, i32) {
    %c0_i32 = arith.constant 0 : i32
    %c0_i32_0 = arith.constant 0 : i32
    %c0_i32_1 = arith.constant 0 : i32
    return %c0_i32, %c0_i32_0 : i32, i32
  }
  func.func @transform_4(%arg0: i32) -> (i32, i32) {
    %c0_i32 = arith.constant 0 : i32
    %c0_i32_0 = arith.constant 0 : i32
    %c0_i32_1 = arith.constant 0 : i32
    return %c0_i32, %c0_i32_0 : i32, i32
  }
  func.func @transform_5(%arg0: i32) -> (i32, i32) {
    %c0_i32 = arith.constant 0 : i32
    %c0_i32_0 = arith.constant 0 : i32
    %c0_i32_1 = arith.constant 0 : i32
    return %c0_i32, %c0_i32_0 : i32, i32
  }
  func.func @transform_6(%arg0: i32) -> (i32, i32) {
    %c0_i32 = arith.constant 0 : i32
    %c0_i32_0 = arith.constant 0 : i32
    %c0_i32_1 = arith.constant 0 : i32
    return %c0_i32, %c0_i32_0 : i32, i32
  }
  func.func @transform_7(%arg0: i32) -> (i32, i32) {
    %c0_i32 = arith.constant 0 : i32
    %c0_i32_0 = arith.constant 0 : i32
    %c0_i32_1 = arith.constant 0 : i32
    return %c0_i32, %c0_i32_0 : i32, i32
  }
  func.func @transform_8(%arg0: i32) -> (i32, i32) {
    %c0_i32 = arith.constant 0 : i32
    %c0_i32_0 = arith.constant 0 : i32
    %c0_i32_1 = arith.constant 0 : i32
    return %c0_i32, %c0_i32_0 : i32, i32
  }
  func.func @transform_9(%arg0: i32) -> (i32, i32) {
    %c0_i32 = arith.constant 0 : i32
    %c0_i32_0 = arith.constant 0 : i32
    %c0_i32_1 = arith.constant 0 : i32
    return %c0_i32, %c0_i32_0 : i32, i32
  }
  func.func @transform_10(%arg0: i32) -> (i32, i32) {
    %c0_i32 = arith.constant 0 : i32
    %c0_i32_0 = arith.constant 0 : i32
    %c0_i32_1 = arith.constant 0 : i32
    return %c0_i32, %c0_i32_0 : i32, i32
  }
  func.func @transform_11(%arg0: i32) -> (i32, i32) {
    %c0_i32 = arith.constant 0 : i32
    %c0_i32_0 = arith.constant 0 : i32
    %c0_i32_1 = arith.constant 0 : i32
    return %c0_i32, %c0_i32_0 : i32, i32
  }
  func.func @transform_12(%arg0: i32) -> (i32, i32) {
    %c0_i32 = arith.constant 0 : i32
    %c0_i32_0 = arith.constant 0 : i32
    %c0_i32_1 = arith.constant 0 : i32
    return %c0_i32, %c0_i32_0 : i32, i32
  }
  func.func @transform_13(%arg0: i32) -> (i32, i32, i32) {
    %c0_i32 = arith.constant 0 : i32
    %c0_i32_0 = arith.constant 0 : i32
    %c0_i32_1 = arith.constant 0 : i32
    return %arg0, %c0_i32, %c0_i32_0 : i32, i32, i32
  }
}

</mosaic_0001>

<bundles_post_ra>
// kernel: tpu_custom_call.1
= control target key start
LH: loop header
LB: loop body
LE: loop exit
PB: predicated region body
PF: predicated region fallthrough
CT: control target
= control target key end

     0   :  { %s2584_s0 = inlined_call_operand.hbm [shape: f32[2,4,256], index: 0, kind: input, shape index: {}]   ;;  %s2585_s1 = inlined_call_operand.hbm [shape: f32[4,256], index: 1, kind: input, shape index: {}]   ;;  %s2586_s2 = inlined_call_operand.vmem [shape: f32[4,4], index: 2, kind: input, shape index: {}]   ;;  %s2587_s3 = inlined_call_operand.hbm [shape: f32[4,32], index: 3, kind: input, shape index: {}]   ;;  %s2588_s4 = inlined_call_operand.hbm [shape: f32[4,4], index: 4, kind: input, shape index: {}]   ;;  %s2589_s5 = inlined_call_operand.vmem [shape: f32[1,4], index: 5, kind: input, shape index: {}]   ;;  %s2590_s6 = inlined_call_operand.hbm [shape: f32[4,4], index: 6, kind: input, shape index: {}]   ;;  %s2591_s7 = inlined_call_operand.vmem [shape: f32[1,4], index: 7, kind: input, shape index: {}]   ;;  %s2592_s8 = inlined_call_operand.hbm [shape: f32[4,4], index: 8, kind: input, shape index: {}]   ;;  %s2593_s9 = inlined_call_operand.hbm [shape: f32[1,4], index: 9, kind: input, shape index: {}]   ;;  %s2594_s10 = inlined_call_operand.vmem [shape: f32[4,4], index: 10, kind: input, shape index: {}]   ;;  %s2595_s11 = inlined_call_operand.vmem [shape: f32[16,32], index: 11, kind: input, shape index: {}]   ;;  %s2596_s12 = inlined_call_operand.vmem [shape: f32[4,256], index: 12, kind: input, shape index: {}]   ;;  %s2597_s13 = inlined_call_operand.hbm [shape: f32[2,16,256], index: 13, kind: output, shape index: {}]  }
   0x1   :  { %2603 = sst [smem:[#allocation20_spill]] %s2585_s1 }
   0x2   :  { %2604 = sst [smem:[#allocation21_spill]] %s2587_s3 }
   0x3   :  { %2605 = sst [smem:[#allocation22_spill]] %s2594_s10 }
   0x4   :  { %2606 = sst [smem:[#allocation23_spill]] %s2595_s11 }
   0x5   :  { %2607 = sst [smem:[#allocation24_spill]] %s2596_s12 }
   0x6   :  { %2608 = sst [smem:[#allocation25_spill]] %s2597_s13 }
   0x7   :  { %18 = vsyncpa [#allocation3], 0 }
   0x8   :  { %20 = vsyncpa [#allocation3 + $0x1], 0 }
   0x9   :  { %21 = vsyncpa [#allocation6], 0 }
   0xa   :  { %22 = vsyncpa [#allocation9], 0 }
   0xb   :  { %23 = vsyncpa [#allocation12], 0 }
   0xc   :  { %24 = vsyncpa [#allocation4], 0 }
   0xd   :  { %26 = vsyncpa [#allocation4 + $0x1], 0  ;;  %s2184_s25 = smov 0   ;;  %s2186_s26 = smov 0  }
   0xe   :  { %s2188_s27 = smov 0   ;;  %s2190_s28 = smov 0  }
   0xf LB: > { %s2102_s29 = smov [#allocation5]   ;;  %s2205_s14 = sadd.s32 4294967295, %s2100_s28   ;;  %s2100_s28 = sphi %s2190_s28, %s2637_s28   ;;  %s2096_s27 = sphi %s2188_s27, %s2636_s27   ;;  %s2092_s26 = sphi %s2186_s26, %s2635_s26   ;;  %s2088_s25 = sphi %s2184_s25, %s2634_s25  }
  0x10   : > { %s354_s30 = sshll.u32 %s2102_s29, 4  ;;  %p1589_p0 = scmp.ge.s32.totalorder %s2100_s28, 1  ;;  %s2210_s30 = int_to_ptr.vmem [resolvable:$true] %s354_s30 }
  0x11   : > { %p2600_p1 = scmp.eq.s32.totalorder %s2205_s14, 0  ;;  %p341_p2 = scmp.lt.s32.totalorder %s2100_s28, 3 }
  0x12   : > { %s2103_s16 = smov [#allocation8]   ;;  %s2104_s18 = smov [#allocation11]  }
  0x13   : > { %p2212_p3 = pnand %p1589_p0, %p341_p2  ;;  %s379_s17 = sshll.u32 %s2103_s16, 4  ;;  %s2219_s17 = int_to_ptr.vmem [resolvable:$true] %s379_s17 }
  0x14   : > { %s407_s19 = sshll.u32 %s2104_s18, 4  ;;  %s2105_s21 = smov [#allocation7]   ;;  %s2227_s19 = int_to_ptr.vmem [resolvable:$true] %s407_s19 }
  0x15   : > { %s2609_s15 = scalar_select %p2212_p3, 1, 0 }
  0x16   : > { %p1734_p5 = pneg %p2212_p3  ;;  %s2229_s22 = sshll.u32 %s2105_s21, 4  ;;  %s369_s22 = int_to_ptr.vmem [resolvable:$true] %s2229_s22 }
  0x17   : > { %s2611_s1 = sld [smem:[#allocation20_spill]] }
  0x18   : > { %p2223_p6 = pnand %p1734_p5, %p2600_p1 }
  0x1a   : > { %p2239_p8 = pneg %p2223_p6 }
  0x1d   : > { %s1824_s29 = scalar_lea.hbm %s2611_s1, 128 }
  0x1e   : > { %p1825_p7 = scmp.ne.s32.totalorder %s2611_s1, %s1824_s29  ;;  %p1831_p11 = scmp.lt.u32.totalorder %s1824_s29, %s2611_s1 }
  0x20   : > { %p1827_p9 = pnand %p2239_p8, %p1825_p7 }
  0x22   : > { %p1828_p10 = pneg %p1827_p9 }
  0x24   : > { %p1833_p12 = pnand %p1831_p11, %p1828_p10 }
  0x26   : > { %1836 = shalt.err (!%p1833_p12)
}
  0x27   : > { %s1837_s13 = scalar_lea.vmem %s2210_s30, 128  ;;  %p1845_p5 = scmp.lt.s32.totalorder %s2210_s30, %s2210_s30 }
  0x28   : > { %p1838_p13 = scmp.ne.s32.totalorder %s2210_s30, %s1837_s13  ;;  %p1846_p4 = scmp.lt.s32.totalorder %s1837_s13, %s1837_s13 }
  0x2a   : > { %p1840_p0 = pnand %p1838_p13, %p2239_p8  ;;  %p1847_p7 = por %p1846_p4, %p1845_p5 }
  0x2c   : > { %p1841_p2 = pneg %p1840_p0 }
  0x2e   : > { %p1848_p9 = pnand %p1847_p7, %p1841_p2 }
  0x30   : > { %1851 = shalt.err (!%p1848_p9)
}
  0x31   : > { %1737 = dma.hbm_to_vmem [thread:$0]  (!%p2223_p6), %s2611_s1, 128, %s2210_s30, [#allocation6]  }
  0x32   : > { %s1852_s16 = scalar_lea.hbm %s2588_s4, 64 }
  0x33   : > { %p1853_p10 = scmp.ne.s32.totalorder %s2588_s4, %s1852_s16  ;;  %p1859_p12 = scmp.lt.u32.totalorder %s1852_s16, %s2588_s4 }
  0x35   : > { %p1855_p4 = pnand %p1853_p10, %p2239_p8 }
  0x37   : > { %p1856_p11 = pneg %p1855_p4 }
  0x39   : > { %p1861_p13 = pnand %p1859_p12, %p1856_p11 }
  0x3b   : > { %1864 = shalt.err (!%p1861_p13)
}
  0x3c   : > { %s1865_s30 = scalar_lea.vmem %s2219_s17, 64  ;;  %p1873_p7 = scmp.lt.s32.totalorder %s2219_s17, %s2219_s17 }
  0x3d   : > { %p1866_p0 = scmp.ne.s32.totalorder %s2219_s17, %s1865_s30  ;;  %p1874_p9 = scmp.lt.s32.totalorder %s1865_s30, %s1865_s30 }
  0x3f   : > { %p1868_p2 = pnand %p1866_p0, %p2239_p8  ;;  %p1875_p10 = por %p1874_p9, %p1873_p7 }
  0x41   : > { %p1869_p5 = pneg %p1868_p2 }
  0x43   : > { %p1876_p4 = pnand %p1875_p10, %p1869_p5 }
  0x45   : > { %1879 = shalt.err (!%p1876_p4)
}
  0x46   : > { %1743 = dma.hbm_to_vmem [thread:$0]  (!%p2223_p6), %s2588_s4, 64, %s2219_s17, [#allocation9]  }
  0x47   : > { %s1880_s24 = scalar_lea.hbm %s2592_s8, 64 }
  0x48   : > { %p1881_p11 = scmp.ne.s32.totalorder %s2592_s8, %s1880_s24  ;;  %p1887_p0 = scmp.lt.u32.totalorder %s1880_s24, %s2592_s8 }
  0x4a   : > { %p1883_p12 = pnand %p1881_p11, %p2239_p8 }
  0x4c   : > { %p1884_p13 = pneg %p1883_p12 }
  0x4e   : > { %p1889_p2 = pnand %p1887_p0, %p1884_p13 }
  0x50   : > { %1892 = shalt.err (!%p1889_p2)
}
  0x51   : > { %s1893_s17 = scalar_lea.vmem %s2227_s19, 64  ;;  %p1901_p10 = scmp.lt.s32.totalorder %s2227_s19, %s2227_s19 }
  0x52   : > { %p1894_p5 = scmp.ne.s32.totalorder %s2227_s19, %s1893_s17  ;;  %p1902_p4 = scmp.lt.s32.totalorder %s1893_s17, %s1893_s17 }
  0x54   : > { %p1896_p7 = pnand %p1894_p5, %p2239_p8  ;;  %p1903_p11 = por %p1902_p4, %p1901_p10 }
  0x56   : > { %p1897_p9 = pneg %p1896_p7 }
  0x58   : > { %p1904_p12 = pnand %p1903_p11, %p1897_p9 }
  0x5a   : > { %1907 = shalt.err (!%p1904_p12)
}
  0x5b   : > { %1749 = dma.hbm_to_vmem [thread:$0]  (!%p2223_p6), %s2592_s8, 64, %s2227_s19, [#allocation12]  }
  0x5c   : > { %s2106_s11 = smov [#allocation10]   ;;  %s2613_s3 = sld [smem:[#allocation21_spill]] }
  0x5d   : > { %s393_s12 = sshll.u32 %s2106_s11, 4  ;;  %s394_s12 = int_to_ptr.vmem [resolvable:$true] %s393_s12 }
  0x62   : > { %s1908_s29 = scalar_lea.hbm %s2613_s3, 64 }
  0x63   : > { %p1909_p13 = scmp.ne.s32.totalorder %s2613_s3, %s1908_s29  ;;  %p1915_p5 = scmp.lt.u32.totalorder %s1908_s29, %s2613_s3 }
  0x65   : > { %p1911_p0 = pnand %p1909_p13, %p2239_p8 }
  0x67   : > { %p1912_p2 = pneg %p1911_p0 }
  0x69   : > { %p1917_p7 = pnand %p1915_p5, %p1912_p2 }
  0x6b   : > { %1920 = shalt.err (!%p1917_p7)
}
  0x6c   : > { %s1921_s19 = scalar_lea.vmem %s369_s22, 64  ;;  %p1929_p11 = scmp.lt.s32.totalorder %s369_s22, %s369_s22 }
  0x6d   : > { %p1922_p9 = scmp.ne.s32.totalorder %s369_s22, %s1921_s19  ;;  %p1930_p12 = scmp.lt.s32.totalorder %s1921_s19, %s1921_s19 }
  0x6f   : > { %p1924_p10 = pnand %p1922_p9, %p2239_p8  ;;  %p1931_p1 = por %p1930_p12, %p1929_p11 }
  0x71   : > { %p1925_p4 = pneg %p1924_p10 }
  0x73   : > { %p1932_p3 = pnand %p1931_p1, %p1925_p4 }
  0x75   : > { %1935 = shalt.err (!%p1932_p3)
}
  0x76   : > { %1740 = dma.hbm_to_vmem [thread:$0]  (!%p2223_p6), %s2613_s3, 64, %s369_s22, [#allocation6]  }
  0x77   : > { %s1936_s24 = scalar_lea.hbm %s2590_s6, 64 }
  0x78   : > { %p1937_p13 = scmp.ne.s32.totalorder %s2590_s6, %s1936_s24  ;;  %p1943_p3 = scmp.lt.u32.totalorder %s1936_s24, %s2590_s6 }
  0x7a   : > { %p1939_p0 = pnand %p1937_p13, %p2239_p8 }
  0x7c   : > { %p1940_p1 = pneg %p1939_p0 }
  0x7e   : > { %p1945_p2 = pnand %p1943_p3, %p1940_p1 }
  0x80   : > { %1948 = shalt.err (!%p1945_p2)
}
  0x81   : > { %s1949_s17 = scalar_lea.vmem %s394_s12, 64  ;;  %p1957_p10 = scmp.lt.s32.totalorder %s394_s12, %s394_s12 }
  0x82   : > { %p1950_p5 = scmp.ne.s32.totalorder %s394_s12, %s1949_s17  ;;  %p1958_p4 = scmp.lt.s32.totalorder %s1949_s17, %s1949_s17 }
  0x84   : > { %p1952_p7 = pnand %p1950_p5, %p2239_p8  ;;  %p1959_p11 = por %p1958_p4, %p1957_p10 }
  0x86   : > { %p1953_p9 = pneg %p1952_p7 }
  0x88   : > { %p1960_p12 = pnand %p1959_p11, %p1953_p9 }
  0x8a   : > { %1963 = shalt.err (!%p1960_p12)
}
  0x8b   : > { %1746 = dma.hbm_to_vmem [thread:$0]  (!%p2223_p6), %s2590_s6, 64, %s394_s12, [#allocation9]  }
  0x8c   : > { %s2107_s30 = smov [#allocation13]   ;;  %s1964_s24 = scalar_lea.hbm %s2593_s9, 16 }
  0x8d   : > { %s418_s10 = sshll.u32 %s2107_s30, 4  ;;  %p1965_p13 = scmp.ne.s32.totalorder %s2593_s9, %s1964_s24  ;;  %s419_s10 = int_to_ptr.vmem [resolvable:$true] %s418_s10 }
  0x8e   : > { %p1971_p3 = scmp.lt.u32.totalorder %s1964_s24, %s2593_s9 }
  0x8f   : > { %p1967_p0 = pnand %p1965_p13, %p2239_p8 }
  0x91   : > { %p1968_p1 = pneg %p1967_p0 }
  0x93   : > { %p1973_p2 = pnand %p1971_p3, %p1968_p1 }
  0x95   : > { %1976 = shalt.err (!%p1973_p2)
}
  0x96   : > { %s1977_s12 = scalar_lea.vmem %s419_s10, 16  ;;  %s1984_s17 = scalar_lea.vmem %s419_s10, 32 }
  0x97   : > { %p1978_p5 = scmp.ne.s32.totalorder %s419_s10, %s1977_s12  ;;  %p1985_p10 = scmp.lt.s32.totalorder %s419_s10, %s419_s10 }
  0x98   : > { %p1986_p4 = scmp.lt.s32.totalorder %s1984_s17, %s1977_s12 }
  0x99   : > { %p1980_p7 = pnand %p1978_p5, %p2239_p8 }
  0x9a   : > { %p1987_p11 = por %p1986_p4, %p1985_p10 }
  0x9b   : > { %p1981_p9 = pneg %p1980_p7 }
  0x9d   : > { %p1988_p12 = pnand %p1987_p11, %p1981_p9 }
  0x9f   : > { %1991 = shalt.err (!%p1988_p12)
}
  0xa0   : > { %1752 = dma.hbm_to_vmem [thread:$0]  (!%p2223_p6), %s2593_s9, 16, %s419_s10, [#allocation12]  }
  0xa1   : > { %s1588_s18 = sadd.s32 4294967294, %s2100_s28   ;;  %s2363_s20 = sadd.s32 1, %s2100_s28  }
  0xa2   : > { %s36_s30 = ssub.s32 %s2100_s28, %s2363_s20  ;;  %s39_s11 = sadd.s32 1, %s2096_s27 }
  0xa3   : > { %p37_p8 = scmp.eq.s32.totalorder %s36_s30, 0  ;;  %p46_p13 = scmp.ne.s32.totalorder %s2096_s27, %s2092_s26 }
  0xa4   : > { %p47_p0 = scmp.eq.s32.totalorder %s2100_s28, 0  ;;  %p52_p1 = scmp.ne.s32.totalorder %s2092_s26, %s2088_s25 }
  0xa5   : > { %s2374_s23 = scalar_select %p37_p8, %s2096_s27, %s39_s11  }
  0xa6   : > { %p2376_p3 = por %p47_p0, %p46_p13  ;;  %p2615_p2 = scmp.eq.s32.totalorder %s2205_s14, 0 }
  0xa7   : > { %p328_p5 = scmp.eq.s32.totalorder %s2205_s14, 1  ;;  %p334_p7 = scmp.eq.s32.totalorder %s1588_s18, 1 }
  0xa8   : > { %p2382_p6 = por %p2615_p2, %p52_p1  ;;  %p1767_p9 = scmp.lt.s32.totalorder %s2100_s28, 2 }
  0xa9   : > { %s438_s29 = sand.u32 1, %s2096_s27   ;;  %p2389_p10 = por %p328_p5, %p46_p13 }
  0xaa   : > { %p2393_p4 = por %p334_p7, %p52_p1  ;;  %s1597_s13 = sshll.u32 %s438_s29, 3 }
  0xab   : > { %s2617_s16 = scalar_select %p2389_p10, 1, 0 }
  0xac   : > { %s2618_s21 = scalar_select %p2393_p4, 1, 0 }
  0xad   : > { %s1640_s12 = sshll.u32 %s2100_s28, 7  ;;  %s442_s18 = scalar_lea.vmem [#allocation2], %s1597_s13 }
  0xae   : > { %s2401_s19 = scalar_lea.hbm %s2584_s0, %s1640_s12  ;;  %s450_s30 = sshll.u32 %s442_s18, 4  ;;  %s2403_s30 = int_to_ptr.vmem [resolvable:$true] %s450_s30 }
  0xaf   : > { %p2407_p11 = pnand %p1767_p9, %p2376_p3  ;;  %s439_s1 = scalar_lea.sflag [#allocation3], %s438_s29 }
  0xb0   : > { %s1992_s3 = scalar_lea.hbm %s2401_s19, 128  ;;  %s1997_s17 = scalar_lea.hbm %s2584_s0, 256 }
  0xb1   : > { %p1993_p12 = scmp.ne.s32.totalorder %s2401_s19, %s1992_s3  ;;  %p1994_p8 = pneg %p2407_p11 }
  0xb2   : > { %p1998_p1 = scmp.lt.u32.totalorder %s2401_s19, %s2584_s0  ;;  %p1999_p3 = scmp.lt.u32.totalorder %s1997_s17, %s1992_s3 }
  0xb3   : > { %p1995_p13 = pnand %p1994_p8, %p1993_p12  ;;  %p2001_p5 = scmp.lt.u32.totalorder %s1992_s3, %s2401_s19 }
  0xb4   : > { %p2000_p2 = por %p1999_p3, %p1998_p1 }
  0xb5   : > { %p1996_p0 = pneg %p1995_p13 }
  0xb6   : > { %p2002_p7 = por %p2001_p5, %p2000_p2 }
  0xb8   : > { %p2003_p9 = pnand %p2002_p7, %p1996_p0 }
  0xba   : > { %2006 = shalt.err (!%p2003_p9)
}
  0xbb   : > { %s2007_s29 = scalar_lea.vmem %s2403_s30, 128  ;;  %s2108_s18 = smov [#allocation2]  }
  0xbc   : > { %p2008_p12 = scmp.ne.s32.totalorder %s2403_s30, %s2007_s29  ;;  %s2012_s13 = sshll.u32 %s2108_s18, 4  ;;  %s2013_s13 = int_to_ptr.vmem [resolvable:$false] %s2012_s13 }
  0xbd   : > { %s2014_s12 = scalar_lea.vmem %s2013_s13, 256  ;;  %p2015_p10 = scmp.lt.s32.totalorder %s2403_s30, %s2013_s13 }
  0xbe   : > { %p2010_p13 = pnand %p2008_p12, %p1994_p8  ;;  %p2016_p1 = scmp.lt.s32.totalorder %s2014_s12, %s2007_s29 }
  0xc0   : > { %p2011_p4 = pneg %p2010_p13  ;;  %p2017_p3 = por %p2016_p1, %p2015_p10 }
  0xc2   : > { %p2018_p2 = pnand %p2017_p3, %p2011_p4 }
  0xc4   : > { %2021 = shalt.err (!%p2018_p2)
}
  0xc5   : > { %1756 = dma.hbm_to_vmem [thread:$0]  (!%p2407_p11), %s2401_s19, 128, %s2403_s30, %s439_s1  }
  0xc6   : > { %p2620_p0 = scmp.ne.s32.totalorder %s2609_s15, 0 }
  0xc7   : > { %s2439_s3 = sand.u32 (!%p2620_p0), 1, %s2092_s26  }
  0xc8   : > { %459 = sbr.rel (%p2620_p0) target bundleno = 2275 (0x8e3), region = 72  ;;  %s1601_s17 = sshll.u32 (!%p2620_p0), %s2439_s3, 3 }
  0xc9   : > { %s462_s24 = scalar_lea.sflag (!%p2620_p0), [#allocation3], %s2439_s3  ;;  %s465_s22 = scalar_lea.vmem (!%p2620_p0), [#allocation2], %s1601_s17 }
  0xcf   : > { %2067 = dma.done.wait (%p2382_p6), %s462_s24, 128  }
  0xd0   : > { %2069 = vsyncadd (%p2382_p6), %s462_s24, 4294967168  ;;  %p2621_p10 = scmp.eq.s32.totalorder %s2205_s14, 0 }
  0xd2   : > { %2071 = dma.done.wait (%p2621_p10), [#allocation6], 192   ;;  %p2622_p4 = pmov %p2621_p10 }
  0xd4   : > { %2073 = vsyncadd (%p2622_p4), [#allocation6], 4294967104  ;;  %p2623_p11 = pmov %p2622_p4 }
  0xd5   : > { %p2624_p8 = pmov %p2622_p4 }
  0xd6   : > { %2075 = dma.done.wait (%p2623_p11), [#allocation9], 128  }
  0xd7   : > { %2077 = vsyncadd (%p2624_p8), [#allocation9], 4294967168  ;;  %p2625_p5 = pmov %p2622_p4 }
  0xd8   : > { %p2626_p7 = pmov %p2622_p4 }
  0xd9   : > { %2079 = dma.done.wait (%p2625_p5), [#allocation12], 80  }
  0xda   : > { %2081 = vsyncadd (%p2626_p7), [#allocation12], 4294967216  ;;  %v545_v0 = vld [vmem:[%s465_s22] sm:$0xff]  ;;  %v532_v1 = vld [vmem:[#allocation5] sm:$0xff]  ;;  %v2109_v4 = vmov 0.0   ;;  %vm2110_vm0 = vmmov 0  }
  0xdb   : > { %v550_v2 = vcombine.high %v545_v0, %v545_v0  ;;  %v547_v3 = vcombine.high %v532_v1, %v532_v1  ;;  %1666 = vmatprep.subr.mxu1 %v2109_v4  ;;  %1668 = vmatprep.mubr.msk.f32.mxu1 %vm2110_vm0, %v2109_v4  ;;  %vm626_vm1 = vcmask 1043456   ;;  %v533_v5 = vld [vmem:[%s2586_s2] sm:$0xf]  ;;  %vm622_vm2 = vcmask 31744   ;;  %v535_v7 = vld [vmem:[#allocation8] sm:$0xf] }
  0xdc   : > { %v539_v9 = vld [vmem:[#allocation11] sm:$0xf]  ;;  %v534_v10 = vld [vmem:[#allocation7] sm:$0xf]  ;;  %v537_v11 = vld [vmem:[#allocation10] sm:$0xf] }
  0xdd   : > { %552 = vmatprep.subr.mxu0 %v550_v2  ;;  %616 = vmatprep.mubr.f32.mxu0 %v547_v3  ;;  %v1619_v16 = vld [vmem:[#allocation13] ss:$0 sm:$0xff]  ;;  %v1616_v22 = vld [vmem:[%s2591_s7] ss:$0 sm:$0xff]  ;;  %vm1094_vm4 = vcmask 27648   ;;  %s2627_s13 = sld [smem:[#allocation22_spill]] }
  0xde   : > { %553 = vmatpush1.xpose.msra.mxu0 %v545_v0  ;;  %1667 = vmatpush3.msk.msra.mxu1 %vm626_vm1, %v534_v10  ;;  %v1613_v23 = vld [vmem:[%s2589_s5] ss:$0 sm:$0xff]  ;;  %vm1260_vm5 = vcmask 261120   ;;  %s2628_s24 = sld [smem:[#allocation23_spill]]  ;;  %s2629_s19 = sld [smem:[#allocation24_spill]] }
  0xdf   : > { %1661 = vmatprep.subr.mxu0 %v2109_v4  ;;  %1676 = vmatprep.subr.mxu1 %v2109_v4  ;;  %s1608_s30 = sshll.u32 %s2439_s3, 5  ;;  %s1641_s18 = sshll.u32 %s2205_s14, 9 }
  0xe0   : > { %s531_s11 = scalar_lea.vmem [#allocation14], %s1608_s30  ;;  %s2630_s17 = sld [smem:[#allocation25_spill]] }
  0xe1   : > { %617 = vmatmul.mubr.f32.vlgmr.msra.gmra.mrb[0].mxu0 %v532_v1  ;;  %s1458_s29 = sshll.u32 %s531_s11, 4  ;;  %s1445_s1 = scalar_lea.sflag [#allocation4], %s2439_s3  ;;  %s2535_s29 = int_to_ptr.vmem [resolvable:$true] %s1458_s29 }
  0xe2   : > { %1663 = vmatprep.mubr.msk.f32.mxu0 %vm2110_vm0, %v2109_v4  ;;  %s2022_s15 = scalar_lea.vmem %s2535_s29, 512  ;;  %p2631_p9 = scmp.ne.s32.totalorder %s2617_s16, 0 }
  0xe3   : > { %v541_v41 = vld [vmem:[%s2627_s13] sm:$0xf]  ;;  %p2023_p6 = scmp.ne.s32.totalorder %s2535_s29, %s2022_s15  ;;  %s2111_s14 = smov [#allocation14]  }
  0xe4   : > { %v542_v46 = vld [vmem:[%s2628_s24] sm:$0xff]  ;;  %v543_v49 = vld [vmem:[%s2628_s24 + $0x8] sm:$0xff]  ;;  %s2026_s10 = sshll.u32 %s2111_s14, 4  ;;  %s2027_s10 = int_to_ptr.vmem [resolvable:$false] %s2026_s10 }
  0xe5   : > { %v544_v50 = vld [vmem:[%s2629_s19] sm:$0xff]  ;;  %p2024_p12 = pnand %p2023_p6, %p2631_p9  ;;  %s2028_s19 = scalar_lea.vmem %s2027_s10, 1024 }
  0xe6   : > { %v1352_v51 = vcombine.high %v544_v50, %v544_v50  ;;  %s2540_s22 = scalar_lea.hbm %s2630_s17, %s1641_s18  ;;  %p2029_p1 = scmp.lt.s32.totalorder %s2535_s29, %s2027_s10 }
  0xe7   : > { %p2025_p13 = pneg %p2024_p12  ;;  %p2030_p3 = scmp.lt.s32.totalorder %s2028_s19, %s2022_s15 }
  0xe9   : > { %p2031_p2 = por %p2030_p3, %p2029_p1 }
  0xeb   : > { %p2032_p0 = pnand %p2031_p2, %p2025_p13 }
 0x1b4   : > { %v2468_v6 = vpop.f32.mrb[0].mxu0 }
 0x1b5   : > { %v620_v8 = vpop.f32.mrb[1].mxu0  ;;  %1662 = vmatpush3.msk.msra.mxu0 %vm626_vm1, %v2468_v6 }
 0x1b6   : > { %1664 = vmatmul.mubr.msk.f32.vlgmr.msra.gmra.mrb[2].mxu0 %vm622_vm2, %v533_v5  ;;  %1671 = vmatprep.subr.mxu0 %v2109_v4 }
 0x1b7   : > { %1672 = vmatpush3.msk.msra.mxu0 %vm626_vm1, %v535_v7  ;;  %1673 = vmatprep.mubr.msk.f32.mxu0 %vm2110_vm0, %v2109_v4 }
 0x1b8   : > { %1681 = vmatprep.subr.mxu0 %v2109_v4 }
 0x1ba   : > { %1674 = vmatmul.mubr.msk.f32.vlgmr.msra.gmra.mrb[4].mxu0 %vm622_vm2, %v2468_v6 }
 0x1bb   : > { %1682 = vmatpush3.msk.msra.mxu0 %vm626_vm1, %v539_v9  ;;  %1683 = vmatprep.mubr.msk.f32.mxu0 %vm2110_vm0, %v2109_v4 }
 0x1bc   : > { %1691 = vmatprep.subr.mxu0 %v2109_v4 }
 0x1be   : > { %1684 = vmatmul.mubr.msk.f32.vlgmr.msra.gmra.mrb[6].mxu0 %vm622_vm2, %v2468_v6 }
 0x1bf   : > { %1693 = vmatprep.mubr.msk.f32.mxu0 %vm2110_vm0, %v2109_v4 }
 0x289   : > { %v696_v12 = vpop.f32.mrb[2].mxu0 }
 0x28a   : > { %v1665_v13 = vpop.f32.mrb[3].mxu0  ;;  %1669 = vmatmul.mubr.msk.f32.vlgmr.msra.gmra.mrb[0].mxu1 %vm622_vm2, %v696_v12 }
 0x28b   : > { %1677 = vmatpush3.msk.msra.mxu1 %vm626_vm1, %v537_v11  ;;  %1678 = vmatprep.mubr.msk.f32.mxu1 %vm2110_vm0, %v2109_v4 }
 0x28c   : > { %1686 = vmatprep.subr.mxu1 %v2109_v4 }
 0x28d   : > { %v856_v14 = vpop.f32.mrb[4].mxu0 }
 0x28e   : > { %v1675_v15 = vpop.f32.mrb[5].mxu0  ;;  %1679 = vmatmul.mubr.msk.f32.vlgmr.msra.gmra.mrb[2].mxu1 %vm622_vm2, %v2468_v6  ;;  %v857_v28 = vadd.f32 %v1613_v23, %v856_v14 }
 0x28f   : > { %1688 = vmatprep.mubr.msk.f32.mxu1 %vm2110_vm0, %v2109_v4 }
 0x291   : > { %v1014_v17 = vpop.f32.mrb[6].mxu0 }
 0x292   : > { %v1015_v18 = vadd.f32 %v1619_v16, %v1014_v17  ;;  %v1685_v19 = vpop.f32.mrb[7].mxu0 }
 0x294   : > { %1692 = vmatpush3.msk.msra.mxu0 %vm626_vm1, %v1015_v18 }
 0x35d   : > { %v772_v20 = vpop.f32.mrb[0].mxu1 }
 0x35e   : > { %v1670_v21 = vpop.f32.mrb[1].mxu1  ;;  %v777_v24 = vmul.f32 0.01, %v772_v20  ;;  %vm776_vm3 = vcmp.gt.f32.partialorder %v772_v20, 0.0 }
 0x360   : > { %v778_v29 = vsel %vm776_vm3, %v772_v20, %v777_v24 }
 0x361   : > { %v935_v25 = vpop.f32.mrb[2].mxu1 }
 0x362   : > { %v936_v26 = vadd.f32 %v1616_v22, %v935_v25  ;;  %v1680_v27 = vpop.f32.mrb[3].mxu1 }
 0x364   : > { %1687 = vmatpush3.msk.msra.mxu1 %vm626_vm1, %v936_v26 }
 0x365   : > { %1689 = vmatmul.mubr.msk.f32.vlgmr.msra.gmra.mrb[4].mxu1 %vm622_vm2, %v857_v28  ;;  %1696 = vmatprep.subr.mxu1 %v2109_v4 }
 0x366   : > { %1697 = vmatpush3.msk.msra.mxu1 %vm626_vm1, %v778_v29  ;;  %1698 = vmatprep.mubr.msk.f32.mxu1 %vm2110_vm0, %v2109_v4 }
 0x367   : > { %1631 = vmatprep.subr.msk.mxu1 %vm626_vm1, %v1352_v51 }
 0x438   : > { %v1090_v30 = vpop.f32.mrb[4].mxu1 }
 0x439   : > { %v1690_v31 = vpop.f32.mrb[5].mxu1  ;;  %v1095_v32 = vsel %vm1094_vm4, %v1090_v30, -inf }
 0x43a   : > { %1096 = vmax.xlane.f32.xlu0 %v1095_v32 }
 0x4c7   : > { %v1097_v33 = vpop.xlane.xlu0 %1096 }
 0x4c8   : > { %v1098_v34 = vsub.f32 %v1090_v30, %v1097_v33 }
 0x4ca   : > { %v1099_v35 = vmul.f32 1.442695, %v1098_v34 }
 0x4cc   : > { %1820 = vpow2.f32 %v1099_v35 }
 0x4d6   : > { %v1821_v36 = vpop.eup %1820 }
 0x4d7   : > { %v1101_v37 = vsel %vm1094_vm4, %v1821_v36, 0.0 }
 0x4d8   : > { %1102 = vadd.xlane.f32.xlu0 %v1101_v37 }
 0x565   : > { %v1103_v38 = vpop.xlane.xlu0 %1102 }
 0x566   : > { %1822 = vrcp.f32 %v1103_v38 }
 0x570   : > { %v1823_v39 = vpop.eup %1822 }
 0x571   : > { %v1105_v40 = vmul.f32 %v1823_v39, %v1821_v36 }
 0x573   : > { %1694 = vmatmul.mubr.msk.f32.vlgmr.msra.gmra.mrb[8].mxu0 %vm622_vm2, %v1105_v40 }
 0x574   : > { %1703 = vmatprep.mubr.msk.f32.mxu0 %vm1260_vm5, %v542_v46 }
 0x646   : > { %v1178_v42 = vpop.f32.mrb[8].mxu0 }
 0x647   : > { %v1182_v43 = vmul.f32 %v1178_v42, %v541_v41  ;;  %v1695_v44 = vpop.f32.mrb[9].mxu0 }
 0x649   : > { %v1183_v45 = vadd.f32 %v1182_v43, %v2468_v6 }
 0x64b   : > { %1699 = vmatmul.mubr.msk.f32.vlgmr.msra.gmra.mrb[6].mxu1 %vm622_vm2, %v1183_v45 }
 0x64c   : > { %1427 = vmatprep.mubr.f32.mxu1 %v2109_v4  ;;  %1632 = vmatpush1.msk.msra.mxu1 %vm626_vm1, %v544_v50 }
 0x71e   : > { %v1256_v47 = vpop.f32.mrb[6].mxu1 }
 0x71f   : > { %v1700_v48 = vpop.f32.mrb[7].mxu1  ;;  %1701 = vmatprep.subr.msk.mxu0 %vm1260_vm5, %v1256_v47 }
 0x720   : > { %1702 = vmatpush3.xpose.msk.msra.mxu0 %vm1260_vm5, %v1256_v47 }
 0x723   : > { %1704 = vmatmul.mubr.msk.f32.vlgmr.msra.gmra.mrb[10].mxu0 %vm1260_vm5, %v543_v49 }
 0x7f6   : > { %v1705_v52 = vpop.f32.mrb[10].mxu0 }
 0x7f7   : > { %v1336_v53 = vpop.f32.mrb[11].mxu0  ;;  %v1348_v55 = vmul.f32 0.01, %v1705_v52  ;;  %vm1346_vm7 = vcmp.gt.f32.partialorder %v1705_v52, 0.0 }
 0x7f8   : > { %vm1345_vm6 = vcmp.gt.f32.partialorder %v1336_v53, 0.0  ;;  %v1347_v54 = vmul.f32 0.01, %v1336_v53 }
 0x7f9   : > { %v1350_v57 = vsel %vm1346_vm7, %v1705_v52, %v1348_v55 }
 0x7fa   : > { %v1349_v56 = vsel %vm1345_vm6, %v1336_v53, %v1347_v54 }
 0x7fb   : > { %1633 = vmatmul.mubr.msk.f32.vlgmr.msra.gmra.mrb[8].mxu1 %vm622_vm2, %v1349_v56 }
 0x7fc   : > { %1433 = vmatprep.mubr.f32.mxu1 %v2109_v4 }
 0x7ff   : > { %1634 = vmatmul.mubr.msk.f32.gmra.mrb[10].mxu1 %vm622_vm2, %v1350_v57 }
 0x8ce   : > { %v1429_v58 = vpop.f32.mrb[8].mxu1 }
 0x8cf   : > { %1440 = vst [vmem:[%s531_s11] sm:$0xff] %v1429_v58  ;;  %v1431_v59 = vpop.f32.mrb[9].mxu1 }
 0x8d0   : > { %1441 = vst [vmem:[%s531_s11 + $0x8] sm:$0xff] %v1431_v59 }
 0x8d2   : > { %v1435_v60 = vpop.f32.mrb[10].mxu1 }
 0x8d3   : > { %1442 = vst [vmem:[%s531_s11 + $0x10] sm:$0xff] %v1435_v60  ;;  %v1437_v61 = vpop.f32.mrb[11].mxu1 }
 0x8d4   : > { %1443 = vst [vmem:[%s531_s11 + $0x18] sm:$0xff] %v1437_v61 }
 0x8d5   : > { %2035 = shalt.err (!%p2032_p0)
}
 0x8d6   : > { %s2036_s30 = scalar_lea.hbm %s2540_s22, 512  ;;  %s2040_s13 = scalar_lea.hbm %s2630_s17, 1024 }
 0x8d7   : > { %p2037_p10 = scmp.ne.s32.totalorder %s2540_s22, %s2036_s30  ;;  %p2041_p8 = scmp.lt.u32.totalorder %s2540_s22, %s2630_s17 }
 0x8d8   : > { %p2042_p5 = scmp.lt.u32.totalorder %s2040_s13, %s2036_s30  ;;  %p2044_p6 = scmp.lt.u32.totalorder %s2036_s30, %s2540_s22 }
 0x8d9   : > { %p2038_p4 = pnand %p2037_p10, %p2631_p9 }
 0x8da   : > { %p2043_p7 = por %p2042_p5, %p2041_p8 }
 0x8db   : > { %p2039_p11 = pneg %p2038_p4 }
 0x8dc   : > { %p2045_p12 = por %p2044_p6, %p2043_p7 }
 0x8de   : > { %p2046_p13 = pnand %p2045_p12, %p2039_p11 }
 0x8e0   : > { %2049 = shalt.err (!%p2046_p13)
}
 0x8e1   : > { %s2112_s15 = smov 256   ;;  %s2113_s10 = smov 16  }
 0x8e2   : > { %1732 = dma.vmem_to_hbm [thread:$0]  (%p2631_p9), %s2535_s29, 512, %s2540_s22, %s1445_s1, %s2112_s15, %s2112_s15, %s2113_s10  }
 0x8e3 PF: > { %s1473_s19 = sand.u32 1, %s2088_s25   ;;  %p2632_p1 = scmp.ne.s32.totalorder %s2618_s21, 0 }
 0x8e4   : > { %p2633_p3 = scmp.ge.s32.totalorder %s2100_s28, 2  ;;  %s1474_s30 = scalar_lea.sflag [#allocation4], %s1473_s19 }
 0x8e6   : > { %p1758_p2 = pnand %p2633_p3, %p2632_p1 }
 0x8e8   : > { %2083 = dma.done.wait (!%p1758_p2), %s1474_s30, 512  }
 0x8e9   : > { %2085 = vsyncadd (!%p1758_p2), %s1474_s30, 4294966784  ;;  %p29_p0 = scmp.ge.s32.totalorder %s2363_s20, 4   ;;  %s2634_s25 = smov %s2092_s26 }
 0x8ea   : > { %s2635_s26 = smov %s2096_s27  ;;  %s2636_s27 = smov %s2374_s23 }
 0x8eb   : > { %s2637_s28 = smov %s2363_s20  ;;  %31 = sbr.rel (!%p29_p0) target bundleno = 15 (0xf), region = 141 }
 0x8f2   :  { %1479 = vsyncpa [#allocation3], 1 }
 0x8f3   :  { %1481 = vsyncpa [#allocation3 + $0x1], 1 }
 0x8f4   :  { %1482 = vsyncpa [#allocation6], 1 }
 0x8f5   :  { %1483 = vsyncpa [#allocation9], 1 }
 0x8f6   :  { %1484 = vsyncpa [#allocation12], 1 }
 0x8f7   :  { %1485 = vsyncpa [#allocation4], 1 }
 0x8f8   :  { %1487 = vsyncpa [#allocation4 + $0x1], 1 }

</bundles_post_ra>
